<compile_context>
chip_gen: v6e
topology: v6e:2x2x1
jax: 0.10.0
libtpu: 0.0.40
codegen_flags: <defaults>
</compile_context>

<pallas_src>
import functools

import jax
import jax.numpy as jnp
from jax.experimental import pallas as pl
from jax.experimental.pallas import tpu as pltpu


def _round_up(x, m):
    return (x + m - 1) // m * m


def mlp_kernel(x_ref, w1_ref, b1_ref, w2_ref, b2_ref, w3_ref, b3_ref, o_ref):
    # fc1 + relu  (f32 x tile cast to bf16 here; VPU cast hides under the DMA)
    x = x_ref[...].astype(jnp.bfloat16)
    h1 = jnp.dot(x, w1_ref[...], preferred_element_type=jnp.float32)
    h1 = jnp.maximum(h1 + b1_ref[...], 0.0)
    # fc2 + tanh (f32 epilogue)
    h2 = jnp.dot(h1.astype(jnp.bfloat16), w2_ref[...],
                 preferred_element_type=jnp.float32)
    h2 = jnp.tanh(h2 + b2_ref[...])
    # fc3 -- only the 10 real output columns are computed and stored
    out = jnp.dot(h2.astype(jnp.bfloat16), w3_ref[...],
                  preferred_element_type=jnp.float32)
    o_ref[...] = (out + b3_ref[...]).astype(o_ref.dtype)


def prepare_params(params):
    """One-time param prep (hoisted out of the per-call jitted path):
    weights -> bf16 MXU operands, biases -> 2D f32 rows."""
    w1, b1, w2, b2, w3, b3 = params
    return (
        w1.astype(jnp.bfloat16), b1.reshape(1, -1).astype(jnp.float32),
        w2.astype(jnp.bfloat16), b2.reshape(1, -1).astype(jnp.float32),
        w3.astype(jnp.bfloat16), b3.reshape(1, -1).astype(jnp.float32),
    )


@functools.partial(jax.jit, static_argnames=("tb_max",))
def net_forward(x, prepared_params, *, tb_max=2048):
    """x: (B, 1, 28, 28) or (B, 784) float32.  Returns (B, 10) float32."""
    w1, b1, w2, b2, w3, b3 = prepared_params
    B = x.shape[0]
    K, H1, H2, NOUT = 28 * 28, 128, 32, 10

    # ---- batch tiling --------------------------------------------------------
    b_pad8 = _round_up(B, 8)                               # sublane alignment
    # cap TB so the grid has >=2 steps when possible (keeps both v7x TCs busy)
    TB = min(tb_max, b_pad8, _round_up(b_pad8 // 2, 8))
    B_pad = _round_up(b_pad8, TB)
    grid = (B_pad // TB,)

    # ---- operand prep: only flatten + (maybe) pad batch rows of x ------------
    x_flat = x.reshape(B, K).astype(jnp.float32)
    if B_pad != B:
        x_flat = jnp.pad(x_flat, ((0, B_pad - B), (0, 0)))

    # ---- specs (last dims equal full array dims -> legal without 128-pad) ----
    const = lambda shape: pl.BlockSpec(shape, lambda i: (0, 0))
    in_specs = [
        pl.BlockSpec((TB, K), lambda i: (i, 0)),   # x tile, pipelined over batch
        const((K, H1)),                            # w1 (VMEM-resident)
        const((1, H1)),                            # b1
        const((H1, H2)),                           # w2
        const((1, H2)),                            # b2
        const((H2, NOUT)),                         # w3
        const((1, NOUT)),                          # b3
    ]
    out_specs = pl.BlockSpec((TB, NOUT), lambda i: (i, 0))

    cost = pl.CostEstimate(
        flops=2 * B_pad * (K * H1 + H1 * H2 + H2 * NOUT),
        transcendentals=B_pad * H2,
        bytes_accessed=(B_pad * K * 4
                        + (w1.size + w2.size + w3.size) * 2
                        + (b1.size + b2.size + b3.size) * 4
                        + B_pad * NOUT * 4),
    )

    out = pl.pallas_call(
        mlp_kernel,
        out_shape=jax.ShapeDtypeStruct((B_pad, NOUT), jnp.float32),
        grid_spec=pltpu.PrefetchScalarGridSpec(
            num_scalar_prefetch=0,
            grid=grid,
            in_specs=in_specs,
            out_specs=out_specs,
        ),
        compiler_params=pltpu.CompilerParams(
            dimension_semantics=("parallel",),      # batch tiles across v7x's 2 TCs
            vmem_limit_bytes=32 * 1024 * 1024,      # ~15 MiB used at TB=2048
        ),
        cost_estimate=cost,
    )(x_flat, w1, b1, w2, b2, w3, b3)

    return out[:B] if B_pad != B else out


def init_params(key):
    """Deterministic init matching nn.Linear shapes: fc1(784,128) fc2(128,32) fc3(32,10).
    Weights stored transposed relative to PyTorch ((in, out)) so kernel does x @ W."""
    k1, k2, k3, k4, k5, k6 = jax.random.split(key, 6)

    def uni(k, shape, fan_in):
        bound = 1.0 / jnp.sqrt(fan_in)
        return jax.random.uniform(k, shape, jnp.float32, -bound, bound)

    w1 = uni(k1, (784, 128), 784)
    b1 = uni(k2, (128,), 784)
    w2 = uni(k3, (128, 32), 128)
    b2 = uni(k4, (32,), 128)
    w3 = uni(k5, (32, 10), 32)
    b3 = uni(k6, (10,), 32)
    return (w1, b1, w2, b2, w3, b3)


def net_forward_ref(x, params):
    """Pure-JAX f32 reference of the PyTorch forward, for correctness checking."""
    w1, b1, w2, b2, w3, b3 = params
    h = x.reshape(x.shape[0], 28 * 28)
    h = jnp.maximum(h @ w1 + b1, 0.0)
    h = jnp.tanh(h @ w2 + b2)
    return h @ w3 + b3


if __name__ == "__main__":
    key = jax.random.PRNGKey(0)
    kx, kp = jax.random.split(key)
    B = 8
    x = jax.random.normal(kx, (B, 1, 28, 28), jnp.float32)  # NCHW, like MNIST
    params = init_params(kp)
    prepared = prepare_params(params)

    out = jax.block_until_ready(net_forward(x, prepared))
    ref = net_forward_ref(x, params)

    assert out.shape == (B, 10), out.shape
    # Tolerance accounts for bf16 MXU operands (f32 accumulation); rel err ~2^-8.
    assert jnp.allclose(out, ref, atol=3e-2, rtol=3e-2), "mismatch vs f32 reference"
    print("KERNEL_OK")
</pallas_src>

<mosaic_0001>
module attributes {stable_mosaic.version = 11 : i64} {
  func.func @mlp_kernel(%arg0: i32, %arg1: memref<8x784xf32, #tpu.memory_space<vmem>>, %arg2: memref<784x128xbf16, #tpu.memory_space<vmem>>, %arg3: memref<1x128xf32, #tpu.memory_space<vmem>>, %arg4: memref<128x32xbf16, #tpu.memory_space<vmem>>, %arg5: memref<1x32xf32, #tpu.memory_space<vmem>>, %arg6: memref<32x10xbf16, #tpu.memory_space<vmem>>, %arg7: memref<1x10xf32, #tpu.memory_space<vmem>>, %arg8: memref<8x10xf32, #tpu.memory_space<vmem>>) attributes {dimension_semantics = [#tpu.dimension_semantics<parallel>], iteration_bounds = array<i64: 1>, scalar_prefetch = 0 : i64, scratch_operands = 0 : i64, tpu.core_type = #tpu.core_type<tc>, window_params = [{transform_indices = @transform_0, window_bounds = array<i64: 8, 784>}, {pipeline_mode = #tpu.pipeline_mode<synchronous>, transform_indices = @transform_1, window_bounds = array<i64: 784, 128>}, {pipeline_mode = #tpu.pipeline_mode<synchronous>, transform_indices = @transform_2, window_bounds = array<i64: 1, 128>}, {pipeline_mode = #tpu.pipeline_mode<synchronous>, transform_indices = @transform_3, window_bounds = array<i64: 128, 32>}, {pipeline_mode = #tpu.pipeline_mode<synchronous>, transform_indices = @transform_4, window_bounds = array<i64: 1, 32>}, {pipeline_mode = #tpu.pipeline_mode<synchronous>, transform_indices = @transform_5, window_bounds = array<i64: 32, 10>}, {pipeline_mode = #tpu.pipeline_mode<synchronous>, transform_indices = @transform_6, window_bounds = array<i64: 1, 10>}, {transform_indices = @transform_7, window_bounds = array<i64: 8, 10>}]} {
    %c0 = arith.constant 0 : index
    %c0_0 = arith.constant 0 : index
    %0 = vector.load %arg1[%c0, %c0_0] : memref<8x784xf32, #tpu.memory_space<vmem>>, vector<8x784xf32>
    %1 = arith.truncf %0 : vector<8x784xf32> to vector<8x784xbf16>
    %c0_1 = arith.constant 0 : index
    %c0_2 = arith.constant 0 : index
    %2 = vector.load %arg2[%c0_1, %c0_2] : memref<784x128xbf16, #tpu.memory_space<vmem>>, vector<784x128xbf16>
    %cst = arith.constant dense<0.000000e+00> : vector<8x128xf32>
    %3 = tpu.matmul %1, %2, %cst {dimension_numbers = #tpu.dot_dimension_numbers<[1], [0], [0], [1], [0, 0, 1, 1], [], []>} : vector<8x784xbf16>, vector<784x128xbf16>, vector<8x128xf32> -> vector<8x128xf32>
    %c0_3 = arith.constant 0 : index
    %c0_4 = arith.constant 0 : index
    %4 = vector.load %arg3[%c0_3, %c0_4] : memref<1x128xf32, #tpu.memory_space<vmem>>, vector<1x128xf32>
    %5 = vector.broadcast %4 : vector<1x128xf32> to vector<8x128xf32>
    %6 = arith.addf %3, %5 : vector<8x128xf32>
    %cst_5 = arith.constant 0.000000e+00 : f32
    %7 = vector.broadcast %cst_5 : f32 to vector<8x128xf32>
    %8 = arith.maximumf %6, %7 : vector<8x128xf32>
    %9 = arith.truncf %8 : vector<8x128xf32> to vector<8x128xbf16>
    %c0_6 = arith.constant 0 : index
    %c0_7 = arith.constant 0 : index
    %10 = vector.load %arg4[%c0_6, %c0_7] : memref<128x32xbf16, #tpu.memory_space<vmem>>, vector<128x32xbf16>
    %cst_8 = arith.constant dense<0.000000e+00> : vector<8x32xf32>
    %11 = tpu.matmul %9, %10, %cst_8 {dimension_numbers = #tpu.dot_dimension_numbers<[1], [0], [0], [1], [0, 0, 1, 1], [], []>} : vector<8x128xbf16>, vector<128x32xbf16>, vector<8x32xf32> -> vector<8x32xf32>
    %c0_9 = arith.constant 0 : index
    %c0_10 = arith.constant 0 : index
    %12 = vector.load %arg5[%c0_9, %c0_10] : memref<1x32xf32, #tpu.memory_space<vmem>>, vector<1x32xf32>
    %13 = vector.broadcast %12 : vector<1x32xf32> to vector<8x32xf32>
    %14 = arith.addf %11, %13 : vector<8x32xf32>
    %15 = math.tanh %14 : vector<8x32xf32>
    %16 = arith.truncf %15 : vector<8x32xf32> to vector<8x32xbf16>
    %c0_11 = arith.constant 0 : index
    %c0_12 = arith.constant 0 : index
    %17 = vector.load %arg6[%c0_11, %c0_12] : memref<32x10xbf16, #tpu.memory_space<vmem>>, vector<32x10xbf16>
    %cst_13 = arith.constant dense<0.000000e+00> : vector<8x10xf32>
    %18 = tpu.matmul %16, %17, %cst_13 {dimension_numbers = #tpu.dot_dimension_numbers<[1], [0], [0], [1], [0, 0, 1, 1], [], []>} : vector<8x32xbf16>, vector<32x10xbf16>, vector<8x10xf32> -> vector<8x10xf32>
    %c0_14 = arith.constant 0 : index
    %c0_15 = arith.constant 0 : index
    %19 = vector.load %arg7[%c0_14, %c0_15] : memref<1x10xf32, #tpu.memory_space<vmem>>, vector<1x10xf32>
    %20 = vector.broadcast %19 : vector<1x10xf32> to vector<8x10xf32>
    %21 = arith.addf %18, %20 : vector<8x10xf32>
    %c0_16 = arith.constant 0 : index
    %c0_17 = arith.constant 0 : index
    %22 = vector.load %arg8[%c0_16, %c0_17] : memref<8x10xf32, #tpu.memory_space<vmem>>, vector<8x10xf32>
    tpu.vector_store %arg8[%c0_16, %c0_17], %21 {strides = array<i32>} : memref<8x10xf32, #tpu.memory_space<vmem>>, vector<8x10xf32>,
    return
  }
  func.func @transform_0(%arg0: i32) -> (i32, i32) {
    %c0_i32 = arith.constant 0 : i32
    %c0_i32_0 = arith.constant 0 : i32
    return %arg0, %c0_i32 : i32, i32
  }
  func.func @transform_1(%arg0: i32) -> (i32, i32) {
    %c0_i32 = arith.constant 0 : i32
    %c0_i32_0 = arith.constant 0 : i32
    %c0_i32_1 = arith.constant 0 : i32
    return %c0_i32, %c0_i32_0 : i32, i32
  }
  func.func @transform_2(%arg0: i32) -> (i32, i32) {
    %c0_i32 = arith.constant 0 : i32
    %c0_i32_0 = arith.constant 0 : i32
    %c0_i32_1 = arith.constant 0 : i32
    return %c0_i32, %c0_i32_0 : i32, i32
  }
  func.func @transform_3(%arg0: i32) -> (i32, i32) {
    %c0_i32 = arith.constant 0 : i32
    %c0_i32_0 = arith.constant 0 : i32
    %c0_i32_1 = arith.constant 0 : i32
    return %c0_i32, %c0_i32_0 : i32, i32
  }
  func.func @transform_4(%arg0: i32) -> (i32, i32) {
    %c0_i32 = arith.constant 0 : i32
    %c0_i32_0 = arith.constant 0 : i32
    %c0_i32_1 = arith.constant 0 : i32
    return %c0_i32, %c0_i32_0 : i32, i32
  }
  func.func @transform_5(%arg0: i32) -> (i32, i32) {
    %c0_i32 = arith.constant 0 : i32
    %c0_i32_0 = arith.constant 0 : i32
    %c0_i32_1 = arith.constant 0 : i32
    return %c0_i32, %c0_i32_0 : i32, i32
  }
  func.func @transform_6(%arg0: i32) -> (i32, i32) {
    %c0_i32 = arith.constant 0 : i32
    %c0_i32_0 = arith.constant 0 : i32
    %c0_i32_1 = arith.constant 0 : i32
    return %c0_i32, %c0_i32_0 : i32, i32
  }
  func.func @transform_7(%arg0: i32) -> (i32, i32) {
    %c0_i32 = arith.constant 0 : i32
    %c0_i32_0 = arith.constant 0 : i32
    return %arg0, %c0_i32 : i32, i32
  }
}

</mosaic_0001>

<bundles_post_ra>
// kernel: net_forward.1
= control target key start
LH: loop header
LB: loop body
LE: loop exit
PB: predicated region body
PF: predicated region fallthrough
CT: control target
= control target key end

     0   :  { %v1067_v44 = vmov 0.0   ;;  %vm1068_vm0 = vmmov 0   ;;  %vm441_vm1 = vcmask 130048   ;;  %s1337_s0 = inlined_call_operand.vmem [shape: f32[8,784], index: 0, kind: input, shape index: {}]   ;;  %s1338_s1 = inlined_call_operand.vmem [shape: bf16[784,128], index: 1, kind: input, shape index: {}]   ;;  %s1339_s2 = inlined_call_operand.vmem [shape: f32[1,128], index: 2, kind: input, shape index: {}]   ;;  %s1340_s3 = inlined_call_operand.vmem [shape: bf16[128,32], index: 3, kind: input, shape index: {}]   ;;  %s1341_s4 = inlined_call_operand.vmem [shape: f32[1,32], index: 4, kind: input, shape index: {}]   ;;  %s1342_s5 = inlined_call_operand.vmem [shape: bf16[32,10], index: 5, kind: input, shape index: {}]   ;;  %s1343_s6 = inlined_call_operand.vmem [shape: f32[1,10], index: 6, kind: input, shape index: {}]   ;;  %s1344_s7 = inlined_call_operand.hbm [shape: f32[8,10], index: 7, kind: output, shape index: {}]  }
   0x1   :  { %v984_v0 = vld [vmem:[%s1338_s1 + $0x78] sm:$0xff]   ;;  %v988_v4 = vld [vmem:[%s1338_s1 + $0x70] sm:$0xff]   ;;  %v992_v8 = vld [vmem:[%s1338_s1 + $0x68] sm:$0xff]  }
   0x2   :  { %v985_v1 = vld [vmem:[%s1338_s1 + $0x38] sm:$0xff]   ;;  %867 = vmatprep.subr.bf16.mxu0 %v984_v0  ;;  %v989_v5 = vld [vmem:[%s1338_s1 + $0x30] sm:$0xff]   ;;  %v993_v9 = vld [vmem:[%s1338_s1 + $0x28] sm:$0xff]  }
   0x3   :  { %v986_v2 = vld [vmem:[%s1338_s1 + $0xf8] sm:$0xff]   ;;  %868 = vmatpush3.bf16.msra.mxu0 %v985_v1  ;;  %v990_v6 = vld [vmem:[%s1338_s1 + $0xf0] sm:$0xff]   ;;  %v994_v10 = vld [vmem:[%s1338_s1 + $0xe8] sm:$0xff]  }
   0x4   :  { %v987_v3 = vld [vmem:[%s1338_s1 + $0xb8] sm:$0xff]   ;;  %889 = vmatprep.subr.bf16.mxu1 %v986_v2  ;;  %869 = vmatprep.subr.bf16.mxu0 %v988_v4  ;;  %v991_v7 = vld [vmem:[%s1338_s1 + $0xb0] sm:$0xff]   ;;  %v995_v11 = vld [vmem:[%s1338_s1 + $0xa8] sm:$0xff]  }
   0x5   :  { %890 = vmatpush3.bf16.msra.mxu1 %v987_v3  ;;  %v996_v12 = vld [vmem:[%s1338_s1 + $0x60] sm:$0xff]   ;;  %v1000_v16 = vld [vmem:[%s1338_s1 + $0x58] sm:$0xff]   ;;  %v1004_v20 = vld [vmem:[%s1338_s1 + $0x50] sm:$0xff]  }
   0x6   :  { %891 = vmatprep.subr.bf16.mxu1 %v990_v6  ;;  %v997_v13 = vld [vmem:[%s1338_s1 + $0x20] sm:$0xff]   ;;  %v1001_v17 = vld [vmem:[%s1338_s1 + $0x18] sm:$0xff]   ;;  %v1005_v21 = vld [vmem:[%s1338_s1 + $0x10] sm:$0xff]  }
   0x7   :  { %870 = vmatpush3.bf16.msra.mxu0 %v989_v5  ;;  %v998_v14 = vld [vmem:[%s1338_s1 + $0xe0] sm:$0xff]   ;;  %v1002_v18 = vld [vmem:[%s1338_s1 + $0xd8] sm:$0xff]   ;;  %v1006_v22 = vld [vmem:[%s1338_s1 + $0xd0] sm:$0xff]  }
   0x8   :  { %871 = vmatprep.subr.bf16.mxu0 %v992_v8  ;;  %v999_v15 = vld [vmem:[%s1338_s1 + $0xa0] sm:$0xff]   ;;  %v1003_v19 = vld [vmem:[%s1338_s1 + $0x98] sm:$0xff]   ;;  %v1007_v23 = vld [vmem:[%s1338_s1 + $0x90] sm:$0xff]  }
   0x9   :  { %892 = vmatpush3.bf16.msra.mxu1 %v991_v7  ;;  %v1008_v24 = vld [vmem:[%s1338_s1 + $0x48] sm:$0xff]   ;;  %v1012_v28 = vld [vmem:[%s1338_s1 + $0x40] sm:$0xff]   ;;  %v1016_v36 = vld [vmem:[%s1338_s1 + $0x178] sm:$0xff]  }
   0xa   :  { %893 = vmatprep.subr.bf16.mxu1 %v994_v10  ;;  %v1009_v25 = vld [vmem:[%s1338_s1 + $0x8] sm:$0xff]   ;;  %v1013_v29 = vld [vmem:[%s1338_s1] sm:$0xff]   ;;  %v31_v37 = vld [vmem:[%s1337_s0 + $0x18] sm:$0xff] }
   0xb   :  { %872 = vmatpush3.bf16.msra.mxu0 %v993_v9  ;;  %v1010_v26 = vld [vmem:[%s1338_s1 + $0xc8] sm:$0xff]   ;;  %v1014_v30 = vld [vmem:[%s1338_s1 + $0xc0] sm:$0xff]   ;;  %v38_v38 = vpack.c.bf16 %v31_v37, %v31_v37  ;;  %v1017_v39 = vld [vmem:[%s1338_s1 + $0x138] sm:$0xff]  }
   0xc   :  { %873 = vmatprep.subr.bf16.mxu0 %v996_v12  ;;  %v1011_v27 = vld [vmem:[%s1338_s1 + $0x88] sm:$0xff]   ;;  %v1015_v33 = vld [vmem:[%s1338_s1 + $0x80] sm:$0xff]   ;;  %v30_v40 = vld [vmem:[%s1337_s0 + $0x10] sm:$0xff] }
   0xd   :  { %894 = vmatpush3.bf16.msra.mxu1 %v995_v11  ;;  %v29_v31 = vld [vmem:[%s1337_s0 + $0x8] sm:$0xff]  ;;  %v28_v34 = vld [vmem:[%s1337_s0] sm:$0xff]  ;;  %517 = vmatprep.mubr.bf16.mxu1 %v38_v38  ;;  %v37_v41 = vpack.c.bf16 %v30_v40, %v30_v40  ;;  %v1018_v42 = vld [vmem:[%s1338_s1 + $0x170] sm:$0xff]  }
   0xe   :  { %895 = vmatprep.subr.bf16.mxu1 %v998_v14  ;;  %v36_v32 = vpack.c.bf16 %v29_v31, %v29_v31  ;;  %v35_v35 = vpack.c.bf16 %v28_v34, %v28_v34  ;;  %v1019_v43 = vld [vmem:[%s1338_s1 + $0x130] sm:$0xff]   ;;  %v1020_v45 = vld [vmem:[%s1338_s1 + $0x168] sm:$0xff]   ;;  %v1022_v47 = vld [vmem:[%s1338_s1 + $0x160] sm:$0xff]  }
   0xf   :  { %874 = vmatpush3.bf16.msra.mxu0 %v997_v13  ;;  %v1021_v46 = vld [vmem:[%s1338_s1 + $0x128] sm:$0xff]   ;;  %v1023_v48 = vld [vmem:[%s1338_s1 + $0x120] sm:$0xff]   ;;  %v1024_v49 = vld [vmem:[%s1338_s1 + $0x158] sm:$0xff]  }
  0x10   :  { %875 = vmatprep.subr.bf16.mxu0 %v1000_v16  ;;  %477 = vmatprep.mubr.bf16.mxu0 %v36_v32  ;;  %v1025_v50 = vld [vmem:[%s1338_s1 + $0x118] sm:$0xff]   ;;  %v1026_v51 = vld [vmem:[%s1338_s1 + $0x150] sm:$0xff]   ;;  %v1032_v53 = vld [vmem:[%s1338_s1 + $0x180] sm:$0xff]  }
  0x11   :  { %896 = vmatpush3.bf16.msra.mxu1 %v999_v15  ;;  %v1027_v52 = vld [vmem:[%s1338_s1 + $0x110] sm:$0xff]   ;;  %v33_v54 = vld [vmem:[%s1337_s0 + $0x28] sm:$0xff]  ;;  %v1030_v60 = vld [vmem:[%s1338_s1 + $0x140] sm:$0xff]  }
  0x12   :  { %897 = vmatprep.subr.bf16.mxu1 %v1002_v18  ;;  %v1028_v55 = vld [vmem:[%s1338_s1 + $0x148] sm:$0xff]   ;;  %v40_v56 = vpack.c.bf16 %v33_v54, %v33_v54  ;;  %v34_v57 = vld [vmem:[%s1337_s0 + $0x30] sm:$0xff] }
  0x13   :  { %876 = vmatpush3.bf16.msra.mxu0 %v1001_v17  ;;  %v41_v58 = vpack.c.bf16 %v34_v57, %v34_v57  ;;  %v1029_v59 = vld [vmem:[%s1338_s1 + $0x108] sm:$0xff]  }
  0x14   :  { %877 = vmatprep.subr.bf16.mxu0 %v1004_v20 }
  0x15   :  { %898 = vmatpush3.bf16.msra.mxu1 %v1003_v19 }
  0x16   :  { %899 = vmatprep.subr.bf16.mxu1 %v1006_v22 }
  0x17   :  { %878 = vmatpush3.bf16.msra.mxu0 %v1005_v21 }
  0x18   :  { %879 = vmatprep.subr.bf16.mxu0 %v1008_v24 }
  0x19   :  { %900 = vmatpush3.bf16.msra.mxu1 %v1007_v23 }
  0x1a   :  { %901 = vmatprep.subr.bf16.mxu1 %v1010_v26 }
  0x1b   :  { %880 = vmatpush3.bf16.msra.mxu0 %v1009_v25 }
  0x1c   :  { %881 = vmatprep.subr.bf16.mxu0 %v1012_v28 }
  0x1d   :  { %902 = vmatpush3.bf16.msra.mxu1 %v1011_v27 }
  0x1e   :  { %903 = vmatprep.subr.bf16.mxu1 %v1014_v30 }
  0x1f   :  { %882 = vmatpush3.bf16.msra.mxu0 %v1013_v29 }
  0x20   :  { %911 = vmatprep.subr.bf16.mxu0 %v1016_v36 }
  0x21   :  { %904 = vmatpush3.bf16.msra.mxu1 %v1015_v33 }
  0x22   :  { %478 = vmatmul.mubr.bf16.vlgmr.msra.gmra.mxu0 %v35_v35  ;;  %947 = vmatprep.subr.bf16.mxu1 %v1067_v44 }
  0x23   :  { %912 = vmatpush3.bf16.msra.mxu0 %v1017_v39  ;;  %557 = vmatprep.mubr.bf16.mxu0 %v40_v56 }
  0x24   :  { %518 = vmatmul.mubr.bf16.vlgmr.msra.gmra.mxu1 %v37_v41  ;;  %913 = vmatprep.subr.bf16.mxu0 %v1018_v42 }
  0x25   :  { %949 = vmatprep.mubr.msk.bf16.mxu1 %vm1068_vm0, %v1067_v44  ;;  %948 = vmatpush3.bf16.msra.mxu1 %v1032_v53 }
  0x26   :  { %953 = vmatprep.subr.bf16.mxu1 %v1067_v44 }
  0x27   :  { %914 = vmatpush3.bf16.msra.mxu0 %v1019_v43 }
  0x28   :  { %915 = vmatprep.subr.bf16.mxu0 %v1020_v45 }
  0x2b   :  { %916 = vmatpush3.bf16.msra.mxu0 %v1021_v46 }
  0x2c   :  { %917 = vmatprep.subr.bf16.mxu0 %v1022_v47  ;;  %950 = vmatmul.mubr.msk.bf16.vlgmr.msra.gmra.mxu1 %vm441_vm1, %v41_v58 }
  0x2d   :  { %969 = vmatprep.mubr.msk.bf16.mxu1 %vm1068_vm0, %v1067_v44 }
  0x2f   :  { %918 = vmatpush3.bf16.msra.mxu0 %v1023_v48 }
  0x30   :  { %919 = vmatprep.subr.bf16.mxu0 %v1024_v49 }
  0x33   :  { %920 = vmatpush3.bf16.msra.mxu0 %v1025_v50 }
  0x34   :  { %921 = vmatprep.subr.bf16.mxu0 %v1026_v51 }
  0x37   :  { %922 = vmatpush3.bf16.msra.mxu0 %v1027_v52 }
  0x38   :  { %923 = vmatprep.subr.bf16.mxu0 %v1028_v55 }
  0x39   :  { %12 = vsyncpa [#allocation3], 0  ;;  %v1031_v61 = vld [vmem:[%s1338_s1 + $0x100] sm:$0xff]   ;;  %v1033_v0 = vld [vmem:[%s1340_s3 + $0x38] sm:$0xff]   ;;  %vm743_vm2 = vcmask 261120   ;;  %vm787_vm3 = vcmask 80896  }
  0x3a   :  { %v32_v62 = vld [vmem:[%s1337_s0 + $0x20] sm:$0xff]  ;;  %954 = vmatpush3.bf16.msra.mxu1 %v1033_v0  ;;  %v1034_v1 = vld [vmem:[%s1340_s3 + $0x30] sm:$0xff]   ;;  %v1035_v2 = vld [vmem:[%s1340_s3 + $0x28] sm:$0xff]  }
  0x3b   :  { %924 = vmatpush3.bf16.msra.mxu0 %v1029_v59  ;;  %v39_v63 = vpack.c.bf16 %v32_v62, %v32_v62  ;;  %955 = vmatprep.subr.bf16.mxu1 %v1067_v44  ;;  %v1036_v3 = vld [vmem:[%s1340_s3 + $0x20] sm:$0xff]   ;;  %v1037_v4 = vld [vmem:[%s1340_s3 + $0x18] sm:$0xff]   ;;  %v1038_v5 = vld [vmem:[%s1340_s3 + $0x10] sm:$0xff]  }
  0x3c   :  { %925 = vmatprep.subr.bf16.mxu0 %v1030_v60  ;;  %v1039_v6 = vld [vmem:[%s1340_s3 + $0x8] sm:$0xff]   ;;  %v1040_v7 = vld [vmem:[%s1340_s3] sm:$0xff]  }
  0x3d   :  { %v803_v21 = vld [vmem:[%s1339_s2] ss:$0 sm:$0xff]  ;;  %v1041_v34 = vld [vmem:[%s1342_s5 + $0x8] sm:$0xff]  }
  0x3e   :  { %956 = vmatpush3.bf16.msra.mxu1 %v1034_v1  ;;  %v1042_v35 = vld [vmem:[%s1342_s5] sm:$0xff]   ;;  %s1069_s5 = smov [#allocation2]  }
  0x3f   :  { %926 = vmatpush3.bf16.msra.mxu0 %v1031_v61  ;;  %957 = vmatprep.subr.bf16.mxu1 %v1067_v44  ;;  %v854_v36 = vld [vmem:[%s1341_s4] ss:$0 sm:$0xff]  ;;  %s795_s20 = sshll.u32 %s1069_s5, 4  ;;  %s796_s20 = int_to_ptr.vmem [resolvable:$true] %s795_s20 }
  0x40   :  { %973 = vmatprep.subr.bf16.mxu0 %v1067_v44  ;;  %s1045_s4 = scalar_lea.vmem %s796_s20, 128  ;;  %p1050_p1 = scmp.lt.s32.totalorder %s796_s20, %s796_s20 }
  0x41   :  { %p1046_p0 = scmp.ne.s32.totalorder %s796_s20, %s1045_s4  ;;  %p1051_p2 = scmp.lt.s32.totalorder %s1045_s4, %s1045_s4 }
  0x42   :  { %558 = vmatmul.mubr.bf16.vlgmr.msra.gmra.mxu0 %v39_v63  ;;  %958 = vmatpush3.bf16.msra.mxu1 %v1035_v2 }
  0x43   :  { %977 = vmatprep.mubr.msk.bf16.mxu0 %vm1068_vm0, %v1067_v44  ;;  %959 = vmatprep.subr.bf16.mxu1 %v1067_v44  ;;  %p1052_p3 = por %p1051_p2, %p1050_p1 }
  0x44   :  { %974 = vmatpush3.bf16.msra.mxu0 %v1041_v34 }
  0x45   :  { %975 = vmatprep.subr.bf16.mxu0 %v1067_v44  ;;  %p1053_p4 = pnand %p1052_p3, %p1046_p0 }
  0x46   :  { %960 = vmatpush3.bf16.msra.mxu1 %v1036_v3 }
  0x47   :  { %961 = vmatprep.subr.bf16.mxu1 %v1067_v44 }
  0x48   :  { %976 = vmatpush3.bf16.msra.mxu0 %v1042_v35 }
  0x4a   :  { %962 = vmatpush3.bf16.msra.mxu1 %v1037_v4 }
  0x4b   :  { %963 = vmatprep.subr.bf16.mxu1 %v1067_v44 }
  0x4e   :  { %964 = vmatpush3.bf16.msra.mxu1 %v1038_v5 }
  0x4f   :  { %965 = vmatprep.subr.bf16.mxu1 %v1067_v44 }
  0x52   :  { %966 = vmatpush3.bf16.msra.mxu1 %v1039_v6 }
  0x53   :  { %967 = vmatprep.subr.bf16.mxu1 %v1067_v44  ;;  %v863_v44 = vld [vmem:[%s1343_s6] ss:$0 sm:$0xff] }
  0x56   :  { %968 = vmatpush3.bf16.msra.mxu1 %v1040_v7 }
  0xe2   :  { %v883_v8 = vpop.f32.mrf.mxu0 }
  0xe4   :  { %v884_v9 = vpop.f32.mrf.mxu0  ;;  %v905_v10 = vpop.f32.mrf.mxu1 }
  0xe5   :  { %v885_v20 = vadd.f32 %v884_v9, %v883_v8 }
  0xe6   :  { %v886_v11 = vpop.f32.mrf.mxu0  ;;  %v906_v12 = vpop.f32.mrf.mxu1 }
  0xe7   :  { %v480_v22 = vadd.f32 %v885_v20, %v803_v21  ;;  %v907_v23 = vadd.f32 %v906_v12, %v905_v10 }
  0xe8   :  { %v887_v13 = vpop.f32.mrf.mxu0  ;;  %v908_v14 = vpop.f32.mrf.mxu1 }
  0xe9   :  { %v520_v26 = vadd.f32 %v907_v23, %v480_v22 }
  0xea   :  { %v909_v15 = vpop.f32.mrf.mxu1 }
  0xec   :  { %v599_v16 = vpop.f32.mrf.mxu1 }
  0xee   :  { %v951_v17 = vpop.f32.mrf.mxu1 }
  0xf0   :  { %v602_v18 = vpop.f32.mrf.mxu1 }
  0xf2   :  { %v952_v19 = vpop.f32.mrf.mxu1 }
 0x102   :  { %v927_v24 = vpop.f32.mrf.mxu0 }
 0x104   :  { %v928_v25 = vpop.f32.mrf.mxu0 }
 0x105   :  { %v929_v27 = vadd.f32 %v928_v25, %v927_v24 }
 0x106   :  { %v930_v28 = vpop.f32.mrf.mxu0 }
 0x107   :  { %v560_v29 = vadd.f32 %v929_v27, %v520_v26 }
 0x108   :  { %v931_v30 = vpop.f32.mrf.mxu0 }
 0x109   :  { %v600_v31 = vadd.f32 %v599_v16, %v560_v29 }
 0x10b   :  { %v605_v32 = vmax.f32 %v600_v31, 0.0 }
 0x10d   :  { %v606_v33 = vpack.c.bf16 %v605_v32, %v605_v32 }
 0x10f   :  { %970 = vmatmul.mubr.bf16.vlgmr.msra.gmra.mxu1 %v606_v33 }
 0x1cf   :  { %v712_v37 = vpop.f32.mrf.mxu1 }
 0x1d0   :  { %v713_v38 = vadd.f32 %v854_v36, %v712_v37 }
 0x1d1   :  { %v971_v39 = vpop.f32.mrf.mxu1 }
 0x1d2   :  { %1043 = vtanh.f32 %v713_v38 }
 0x1d3   :  { %v715_v40 = vpop.f32.mrf.mxu1 }
 0x1d5   :  { %v972_v41 = vpop.f32.mrf.mxu1 }
 0x1df   :  { %v1044_v42 = vpop.eup %1043 }
 0x1e0   :  { %v719_v43 = vpack.c.bf16 %v1044_v42, %v1044_v42 }
 0x1e2   :  { %978 = vmatmul.mubr.msk.bf16.vlgmr.msra.gmra.mxu0 %vm743_vm2, %v719_v43 }
 0x2a2   :  { %v781_v45 = vpop.f32.mrf.mxu0 }
 0x2a3   :  { %v782_v46 = vadd.f32 %v863_v44, %v781_v45 }
 0x2a4   :  { %v979_v47 = vpop.f32.mrf.mxu0 }
 0x2a5   :  { %788 = vst.msk [vmem:[#allocation2] sm:$0xff] %vm787_vm3, %v782_v46 }
 0x2a6   :  { %v784_v48 = vpop.f32.mrf.mxu0 }
 0x2a7   :  { %1056 = shalt.err (!%p1053_p4)
}
 0x2a8   :  { %798 = dma.vmem_to_hbm [thread:$0]  %s796_s20, 128, %s1344_s7, [#allocation3]   ;;  %v980_v49 = vpop.f32.mrf.mxu0 }
 0x2a9   :  { %1065 = dma.done.wait [#allocation3], 128  }
 0x2aa   :  { %1066 = vsyncadd [#allocation3], 4294967168 }
 0x2ab   :  { %802 = vsyncpa [#allocation3], 1 }

</bundles_post_ra>
